<compile_context>
chip_gen: v7x
topology: tpu7x:2x2x1
jax: 0.10.0
libtpu: 0.0.40
codegen_flags: <defaults>
</compile_context>

<pallas_src>
import functools

import jax
import jax.numpy as jnp
from jax.experimental import pallas as pl
from jax.experimental.pallas import tpu as pltpu


LN_EPS = 1e-5  # torch.nn.LayerNorm default


def _layernorm(y, gamma, beta):
    mu = jnp.mean(y, axis=-1, keepdims=True)
    var = jnp.mean((y - mu) ** 2, axis=-1, keepdims=True)  # biased, like torch
    return (y - mu) * jax.lax.rsqrt(var + LN_EPS) * gamma + beta


def transformer_block_kernel(
    x_ref,                    # (1, T, K)   f32
    wqkv_ref,                 # (K, 3*H*K)  bf16  [Wq*k^-0.5 | Wk | Wv]
    wo_ref,                   # (H*K, K)    bf16
    g1_ref, b1_ref,           # (1, K) f32  LayerNorm1 gamma / beta
    w1_ref, bb1_ref,          # (K, 4K) bf16, (1, 4K) f32
    w2_ref, bb2_ref,          # (4K, K) bf16, (1, K) f32
    g2_ref, b2_ref,           # (1, K) f32  LayerNorm2 gamma / beta
    o_ref,                    # (1, T, K)
    *, head: int,
):
    t, k = x_ref.shape[1], x_ref.shape[2]
    hk = head * k
    x = x_ref[0].astype(jnp.float32)            # (T, K) residual path (f32)
    x_bf = x.astype(jnp.bfloat16)               # MXU operand

    # --- fused Q/K/V projection: one lane-dense matmul, output dim 3*H*K ---
    qkv = jnp.dot(x_bf, wqkv_ref[...],
                  preferred_element_type=jnp.float32).astype(jnp.bfloat16)  # (T, 3HK)

    # Head-major (H, T, K) bf16 views (static lane slices + leading-dim stack).
    # The k**-0.5 score scale is already folded into Wq in the wrapper.
    def heads(base):
        return jnp.stack([qkv[:, base + h * k: base + (h + 1) * k]
                          for h in range(head)], axis=0)            # (H, T, K)
    q3, k3, v3 = heads(0), heads(hk), heads(2 * hk)

    # --- scores + softmax batched over all heads (single XLU/EUP chain) ---
    scores = jnp.einsum("htd,hsd->hts", q3, k3,
                        preferred_element_type=jnp.float32)          # (H, T, T)
    scores = scores - jnp.max(scores, axis=-1, keepdims=True)
    p = jnp.exp(scores)
    p = p * pl.reciprocal(jnp.sum(p, axis=-1, keepdims=True), approx=True)

    head_out = jnp.einsum("hts,hsd->htd", p.astype(jnp.bfloat16), v3,
                          preferred_element_type=jnp.float32)        # (H, T, K)

    # --- output projection: lane-concat heads, single 128-deep contraction ---
    head_cat = jnp.concatenate([head_out[h] for h in range(head)],
                               axis=-1).astype(jnp.bfloat16)         # (T, H*K)
    attend = jnp.dot(head_cat, wo_ref[...],
                     preferred_element_type=jnp.float32)             # (T, K)

    # --- norm1(attend + x) ---
    x1 = _layernorm(attend + x, g1_ref[...], b1_ref[...])

    # --- feed-forward: Linear(K, 4K) -> ReLU -> Linear(4K, K) ---
    hid = jnp.dot(x1.astype(jnp.bfloat16), w1_ref[...],
                  preferred_element_type=jnp.float32) + bb1_ref[...]
    hid = jnp.maximum(hid, 0.0)
    mlp = jnp.dot(hid.astype(jnp.bfloat16), w2_ref[...],
                  preferred_element_type=jnp.float32) + bb2_ref[...]

    # --- norm2(mlp + x1), single store per grid step ---
    out = _layernorm(mlp + x1, g2_ref[...], b2_ref[...])
    # NOTE: K < 128 here, so this is a masked partial store; for production
    # shapes present a lane-dense (>=128) output last dim instead.
    o_ref[0] = out.astype(o_ref.dtype)


def transformer_block(x, params, *, head):
    b, t, k = x.shape

    # Fused QKV weight (K, 3*H*K); attention scale k**-0.5 folded into Wq
    # before the bf16 cast (static -> free at runtime).
    wqkv = jnp.concatenate(
        [params["wq"] * (k ** -0.5), params["wk"], params["wv"]],
        axis=1).astype(jnp.bfloat16)
    wo = params["wo"].astype(jnp.bfloat16)     # (H*K, K), rows already head-major
    w1 = params["w1"].astype(jnp.bfloat16)
    w2 = params["w2"].astype(jnp.bfloat16)

    weights = [wqkv, wo,
               params["g1"], params["b1"],
               w1, params["bb1"], w2, params["bb2"],
               params["g2"], params["b2"]]

    def full(a):
        nd = a.ndim
        # Constant block index across the grid -> DMA'd once per buffer.
        # TODO(synk): at production shapes, single-buffer these weight operands
        # (pipeline_mode=pl.Buffered(1), or memory_space=pl.ANY + one manual
        # DMA at step 0) to halve the resident weight footprint on v7x.
        return pl.BlockSpec(a.shape, lambda *args, _nd=nd: (0,) * _nd)

    weight_specs = [full(w) for w in weights]

    return pl.pallas_call(
        functools.partial(transformer_block_kernel, head=head),
        out_shape=jax.ShapeDtypeStruct((b, t, k), x.dtype),
        grid_spec=pltpu.PrefetchScalarGridSpec(
            num_scalar_prefetch=0,
            grid=(b,),
            in_specs=[pl.BlockSpec((1, t, k), lambda i: (i, 0, 0))] + weight_specs,
            out_specs=pl.BlockSpec((1, t, k), lambda i: (i, 0, 0)),
        ),
        compiler_params=pltpu.CompilerParams(
            # Batch axis is parallel (megacore sharding on v7x). For realistic
            # shapes add a parallel query-tile axis + an arbitrary key/FFN
            # reduction axis with online-softmax / accumulator scratch.
            dimension_semantics=("parallel",),
            # Above the scoped defaults (16 MiB v5e / 32 MiB v6e, v7x) and
            # below every physical capacity (64 MiB v7x, 128 MiB v5e/v6e).
            vmem_limit_bytes=48 * 1024 * 1024),
    )(x, *weights)


def transformer_block_ref(x, params, *, head):
    """Pure-JAX f32 reference mirroring the PyTorch forward."""
    b, t, k = x.shape
    scale = k ** (-0.25)
    q = (x @ params["wq"]).reshape(b, t, head, k).transpose(0, 2, 1, 3) * scale
    kk = (x @ params["wk"]).reshape(b, t, head, k).transpose(0, 2, 1, 3) * scale
    v = (x @ params["wv"]).reshape(b, t, head, k).transpose(0, 2, 1, 3)
    dot = jax.nn.softmax(jnp.einsum("bhtd,bhsd->bhts", q, kk), axis=-1)
    att = jnp.einsum("bhts,bhsd->bhtd", dot, v).transpose(0, 2, 1, 3).reshape(b, t, head * k)
    attend = att @ params["wo"]
    x1 = _layernorm(attend + x, params["g1"][0], params["b1"][0])
    hid = jnp.maximum(x1 @ params["w1"] + params["bb1"][0], 0.0)
    mlp = hid @ params["w2"] + params["bb2"][0]
    return _layernorm(mlp + x1, params["g2"][0], params["b2"][0])


def init_params(key, k, head):
    ks = jax.random.split(key, 8)
    s = 0.05
    return {
        # Linear weights stored transposed: (in, out)
        "wq": s * jax.random.normal(ks[0], (k, k * head), jnp.float32),
        "wk": s * jax.random.normal(ks[1], (k, k * head), jnp.float32),
        "wv": s * jax.random.normal(ks[2], (k, k * head), jnp.float32),
        "wo": s * jax.random.normal(ks[3], (k * head, k), jnp.float32),
        "g1": jnp.ones((1, k), jnp.float32),
        "b1": jnp.zeros((1, k), jnp.float32),
        "w1": s * jax.random.normal(ks[4], (k, 4 * k), jnp.float32),
        "bb1": s * jax.random.normal(ks[5], (1, 4 * k), jnp.float32),
        "w2": s * jax.random.normal(ks[6], (4 * k, k), jnp.float32),
        "bb2": s * jax.random.normal(ks[7], (1, k), jnp.float32),
        "g2": jnp.ones((1, k), jnp.float32),
        "b2": jnp.zeros((1, k), jnp.float32),
    }


if __name__ == "__main__":
    B, T, K, HEAD = 2, 8, 32, 4
    key = jax.random.PRNGKey(0)
    kx, kp = jax.random.split(key)
    x = jax.random.normal(kx, (B, T, K), jnp.float32)
    params = init_params(kp, K, HEAD)

    out = jax.block_until_ready(transformer_block(x, params, head=HEAD))

    ref = transformer_block_ref(x, params, head=HEAD)
    assert out.shape == (B, T, K)
    # bf16 MXU operands + approx reciprocal vs the pure-f32 reference.
    assert jnp.allclose(out, ref, atol=2e-2, rtol=2e-2), "mismatch vs JAX reference"
    print("KERNEL_OK")
</pallas_src>

<mosaic_0001>
module attributes {stable_mosaic.version = 11 : i64} {
  func.func @transformer_block_kernel(%arg0: i32, %arg1: memref<1x8x32xf32, #tpu.memory_space<vmem>>, %arg2: memref<32x384xbf16, #tpu.memory_space<vmem>>, %arg3: memref<128x32xbf16, #tpu.memory_space<vmem>>, %arg4: memref<1x32xf32, #tpu.memory_space<vmem>>, %arg5: memref<1x32xf32, #tpu.memory_space<vmem>>, %arg6: memref<32x128xbf16, #tpu.memory_space<vmem>>, %arg7: memref<1x128xf32, #tpu.memory_space<vmem>>, %arg8: memref<128x32xbf16, #tpu.memory_space<vmem>>, %arg9: memref<1x32xf32, #tpu.memory_space<vmem>>, %arg10: memref<1x32xf32, #tpu.memory_space<vmem>>, %arg11: memref<1x32xf32, #tpu.memory_space<vmem>>, %arg12: memref<1x8x32xf32, #tpu.memory_space<vmem>>) attributes {dimension_semantics = [#tpu.dimension_semantics<parallel>], iteration_bounds = array<i64: 2>, scalar_prefetch = 0 : i64, scratch_operands = 0 : i64, tpu.core_type = #tpu.core_type<tc>, window_params = [{transform_indices = @transform_0, window_bounds = array<i64: 1, 8, 32>}, {pipeline_mode = #tpu.pipeline_mode<synchronous>, transform_indices = @transform_1, window_bounds = array<i64: 32, 384>}, {pipeline_mode = #tpu.pipeline_mode<synchronous>, transform_indices = @transform_2, window_bounds = array<i64: 128, 32>}, {pipeline_mode = #tpu.pipeline_mode<synchronous>, transform_indices = @transform_3, window_bounds = array<i64: 1, 32>}, {pipeline_mode = #tpu.pipeline_mode<synchronous>, transform_indices = @transform_4, window_bounds = array<i64: 1, 32>}, {pipeline_mode = #tpu.pipeline_mode<synchronous>, transform_indices = @transform_5, window_bounds = array<i64: 32, 128>}, {pipeline_mode = #tpu.pipeline_mode<synchronous>, transform_indices = @transform_6, window_bounds = array<i64: 1, 128>}, {pipeline_mode = #tpu.pipeline_mode<synchronous>, transform_indices = @transform_7, window_bounds = array<i64: 128, 32>}, {pipeline_mode = #tpu.pipeline_mode<synchronous>, transform_indices = @transform_8, window_bounds = array<i64: 1, 32>}, {pipeline_mode = #tpu.pipeline_mode<synchronous>, transform_indices = @transform_9, window_bounds = array<i64: 1, 32>}, {pipeline_mode = #tpu.pipeline_mode<synchronous>, transform_indices = @transform_10, window_bounds = array<i64: 1, 32>}, {transform_indices = @transform_11, window_bounds = array<i64: 1, 8, 32>}]} {
    %c0 = arith.constant 0 : index
    %c0_0 = arith.constant 0 : index
    %c0_1 = arith.constant 0 : index
    %0 = vector.load %arg1[%c0, %c0_0, %c0_1] : memref<1x8x32xf32, #tpu.memory_space<vmem>>, vector<1x8x32xf32>
    %1 = vector.shape_cast %0 : vector<1x8x32xf32> to vector<8x32xf32>
    %2 = arith.truncf %1 : vector<8x32xf32> to vector<8x32xbf16>
    %c0_2 = arith.constant 0 : index
    %c0_3 = arith.constant 0 : index
    %3 = vector.load %arg2[%c0_2, %c0_3] : memref<32x384xbf16, #tpu.memory_space<vmem>>, vector<32x384xbf16>
    %cst = arith.constant dense<0.000000e+00> : vector<8x384xf32>
    %4 = tpu.matmul %2, %3, %cst {dimension_numbers = #tpu.dot_dimension_numbers<[1], [0], [0], [1], [0, 0, 1, 1], [], []>} : vector<8x32xbf16>, vector<32x384xbf16>, vector<8x384xf32> -> vector<8x384xf32>
    %5 = arith.truncf %4 : vector<8x384xf32> to vector<8x384xbf16>
    %6 = vector.extract_strided_slice %5 {offsets = [0, 0], sizes = [8, 32], strides = [1, 1]} : vector<8x384xbf16> to vector<8x32xbf16>
    %7 = vector.extract_strided_slice %5 {offsets = [0, 32], sizes = [8, 32], strides = [1, 1]} : vector<8x384xbf16> to vector<8x32xbf16>
    %8 = vector.extract_strided_slice %5 {offsets = [0, 64], sizes = [8, 32], strides = [1, 1]} : vector<8x384xbf16> to vector<8x32xbf16>
    %9 = vector.extract_strided_slice %5 {offsets = [0, 96], sizes = [8, 32], strides = [1, 1]} : vector<8x384xbf16> to vector<8x32xbf16>
    %10 = vector.shape_cast %6 : vector<8x32xbf16> to vector<1x8x32xbf16>
    %11 = vector.shape_cast %7 : vector<8x32xbf16> to vector<1x8x32xbf16>
    %12 = vector.shape_cast %8 : vector<8x32xbf16> to vector<1x8x32xbf16>
    %13 = vector.shape_cast %9 : vector<8x32xbf16> to vector<1x8x32xbf16>
    %14 = tpu.concatenate %10, %11, %12, %13 in 0 : vector<1x8x32xbf16>, vector<1x8x32xbf16>, vector<1x8x32xbf16>, vector<1x8x32xbf16> -> vector<4x8x32xbf16>
    %15 = vector.extract_strided_slice %5 {offsets = [0, 128], sizes = [8, 32], strides = [1, 1]} : vector<8x384xbf16> to vector<8x32xbf16>
    %16 = vector.extract_strided_slice %5 {offsets = [0, 160], sizes = [8, 32], strides = [1, 1]} : vector<8x384xbf16> to vector<8x32xbf16>
    %17 = vector.extract_strided_slice %5 {offsets = [0, 192], sizes = [8, 32], strides = [1, 1]} : vector<8x384xbf16> to vector<8x32xbf16>
    %18 = vector.extract_strided_slice %5 {offsets = [0, 224], sizes = [8, 32], strides = [1, 1]} : vector<8x384xbf16> to vector<8x32xbf16>
    %19 = vector.shape_cast %15 : vector<8x32xbf16> to vector<1x8x32xbf16>
    %20 = vector.shape_cast %16 : vector<8x32xbf16> to vector<1x8x32xbf16>
    %21 = vector.shape_cast %17 : vector<8x32xbf16> to vector<1x8x32xbf16>
    %22 = vector.shape_cast %18 : vector<8x32xbf16> to vector<1x8x32xbf16>
    %23 = tpu.concatenate %19, %20, %21, %22 in 0 : vector<1x8x32xbf16>, vector<1x8x32xbf16>, vector<1x8x32xbf16>, vector<1x8x32xbf16> -> vector<4x8x32xbf16>
    %24 = vector.extract_strided_slice %5 {offsets = [0, 256], sizes = [8, 32], strides = [1, 1]} : vector<8x384xbf16> to vector<8x32xbf16>
    %25 = vector.extract_strided_slice %5 {offsets = [0, 288], sizes = [8, 32], strides = [1, 1]} : vector<8x384xbf16> to vector<8x32xbf16>
    %26 = vector.extract_strided_slice %5 {offsets = [0, 320], sizes = [8, 32], strides = [1, 1]} : vector<8x384xbf16> to vector<8x32xbf16>
    %27 = vector.extract_strided_slice %5 {offsets = [0, 352], sizes = [8, 32], strides = [1, 1]} : vector<8x384xbf16> to vector<8x32xbf16>
    %28 = vector.shape_cast %24 : vector<8x32xbf16> to vector<1x8x32xbf16>
    %29 = vector.shape_cast %25 : vector<8x32xbf16> to vector<1x8x32xbf16>
    %30 = vector.shape_cast %26 : vector<8x32xbf16> to vector<1x8x32xbf16>
    %31 = vector.shape_cast %27 : vector<8x32xbf16> to vector<1x8x32xbf16>
    %32 = tpu.concatenate %28, %29, %30, %31 in 0 : vector<1x8x32xbf16>, vector<1x8x32xbf16>, vector<1x8x32xbf16>, vector<1x8x32xbf16> -> vector<4x8x32xbf16>
    "tpu.trace_start"() <{level = 10 : i32, message = "htd,hsd->hts"}> : () -> ()
    %cst_4 = arith.constant dense<0.000000e+00> : vector<4x8x8xf32>
    %33 = tpu.matmul %14, %23, %cst_4 {dimension_numbers = #tpu.dot_dimension_numbers<[2], [2], [1], [1], [0, 0, 0, 1, 1, 1], [0], [0]>} : vector<4x8x32xbf16>, vector<4x8x32xbf16>, vector<4x8x8xf32> -> vector<4x8x8xf32>
    "tpu.trace_stop"() : () -> ()
    %cst_5 = arith.constant dense<0xFF800000> : vector<4x8xf32>
    %34 = vector.multi_reduction <maximumf>, %33, %cst_5 [2] : vector<4x8x8xf32> to vector<4x8xf32>
    %35 = vector.shape_cast %34 : vector<4x8xf32> to vector<4x8x1xf32>
    %36 = vector.broadcast %35 : vector<4x8x1xf32> to vector<4x8x8xf32>
    %37 = arith.subf %33, %36 : vector<4x8x8xf32>
    %38 = math.exp %37 : vector<4x8x8xf32>
    %cst_6 = arith.constant dense<0.000000e+00> : vector<4x8xf32>
    %39 = vector.multi_reduction <add>, %38, %cst_6 [2] : vector<4x8x8xf32> to vector<4x8xf32>
    %40 = vector.shape_cast %39 : vector<4x8xf32> to vector<4x8x1xf32>
    %41 = tpu.reciprocal %40 {approx = true} : vector<4x8x1xf32> -> vector<4x8x1xf32>
    %42 = vector.broadcast %41 : vector<4x8x1xf32> to vector<4x8x8xf32>
    %43 = arith.mulf %38, %42 : vector<4x8x8xf32>
    %44 = arith.truncf %43 : vector<4x8x8xf32> to vector<4x8x8xbf16>
    "tpu.trace_start"() <{level = 10 : i32, message = "hts,hsd->htd"}> : () -> ()
    %cst_7 = arith.constant dense<0.000000e+00> : vector<4x8x32xf32>
    %45 = tpu.matmul %44, %32, %cst_7 {dimension_numbers = #tpu.dot_dimension_numbers<[2], [1], [1], [2], [0, 0, 0, 1, 1, 2], [0], [0]>} : vector<4x8x8xbf16>, vector<4x8x32xbf16>, vector<4x8x32xf32> -> vector<4x8x32xf32>
    "tpu.trace_stop"() : () -> ()
    %46 = vector.extract_strided_slice %45 {offsets = [0, 0, 0], sizes = [1, 8, 32], strides = [1, 1, 1]} : vector<4x8x32xf32> to vector<1x8x32xf32>
    %47 = vector.shape_cast %46 : vector<1x8x32xf32> to vector<8x32xf32>
    %48 = vector.extract_strided_slice %45 {offsets = [1, 0, 0], sizes = [1, 8, 32], strides = [1, 1, 1]} : vector<4x8x32xf32> to vector<1x8x32xf32>
    %49 = vector.shape_cast %48 : vector<1x8x32xf32> to vector<8x32xf32>
    %50 = vector.extract_strided_slice %45 {offsets = [2, 0, 0], sizes = [1, 8, 32], strides = [1, 1, 1]} : vector<4x8x32xf32> to vector<1x8x32xf32>
    %51 = vector.shape_cast %50 : vector<1x8x32xf32> to vector<8x32xf32>
    %52 = vector.extract_strided_slice %45 {offsets = [3, 0, 0], sizes = [1, 8, 32], strides = [1, 1, 1]} : vector<4x8x32xf32> to vector<1x8x32xf32>
    %53 = vector.shape_cast %52 : vector<1x8x32xf32> to vector<8x32xf32>
    %54 = tpu.concatenate %47, %49, %51, %53 in 1 : vector<8x32xf32>, vector<8x32xf32>, vector<8x32xf32>, vector<8x32xf32> -> vector<8x128xf32>
    %55 = arith.truncf %54 : vector<8x128xf32> to vector<8x128xbf16>
    %c0_8 = arith.constant 0 : index
    %c0_9 = arith.constant 0 : index
    %56 = vector.load %arg3[%c0_8, %c0_9] : memref<128x32xbf16, #tpu.memory_space<vmem>>, vector<128x32xbf16>
    %cst_10 = arith.constant dense<0.000000e+00> : vector<8x32xf32>
    %57 = tpu.matmul %55, %56, %cst_10 {dimension_numbers = #tpu.dot_dimension_numbers<[1], [0], [0], [1], [0, 0, 1, 1], [], []>} : vector<8x128xbf16>, vector<128x32xbf16>, vector<8x32xf32> -> vector<8x32xf32>
    %58 = arith.addf %57, %1 : vector<8x32xf32>
    %c0_11 = arith.constant 0 : index
    %c0_12 = arith.constant 0 : index
    %59 = vector.load %arg4[%c0_11, %c0_12] : memref<1x32xf32, #tpu.memory_space<vmem>>, vector<1x32xf32>
    %c0_13 = arith.constant 0 : index
    %c0_14 = arith.constant 0 : index
    %60 = vector.load %arg5[%c0_13, %c0_14] : memref<1x32xf32, #tpu.memory_space<vmem>>, vector<1x32xf32>
    %cst_15 = arith.constant dense<0.000000e+00> : vector<8xf32>
    %61 = vector.multi_reduction <add>, %58, %cst_15 [1] : vector<8x32xf32> to vector<8xf32>
    %62 = vector.shape_cast %61 : vector<8xf32> to vector<8x1xf32>
    %cst_16 = arith.constant 3.200000e+01 : f32
    %63 = vector.broadcast %cst_16 : f32 to vector<8x1xf32>
    %64 = arith.divf %62, %63 : vector<8x1xf32>
    %65 = vector.broadcast %64 : vector<8x1xf32> to vector<8x32xf32>
    %66 = arith.subf %58, %65 : vector<8x32xf32>
    %67 = arith.mulf %66, %66 : vector<8x32xf32>
    %cst_17 = arith.constant dense<0.000000e+00> : vector<8xf32>
    %68 = vector.multi_reduction <add>, %67, %cst_17 [1] : vector<8x32xf32> to vector<8xf32>
    %69 = vector.shape_cast %68 : vector<8xf32> to vector<8x1xf32>
    %cst_18 = arith.constant 3.200000e+01 : f32
    %70 = vector.broadcast %cst_18 : f32 to vector<8x1xf32>
    %71 = arith.divf %69, %70 : vector<8x1xf32>
    %72 = vector.broadcast %64 : vector<8x1xf32> to vector<8x32xf32>
    %73 = arith.subf %58, %72 : vector<8x32xf32>
    %cst_19 = arith.constant 9.99999974E-6 : f32
    %74 = vector.broadcast %cst_19 : f32 to vector<8x1xf32>
    %75 = arith.addf %71, %74 : vector<8x1xf32>
    %76 = math.rsqrt %75 : vector<8x1xf32>
    %77 = vector.broadcast %76 : vector<8x1xf32> to vector<8x32xf32>
    %78 = arith.mulf %73, %77 : vector<8x32xf32>
    %79 = vector.broadcast %59 : vector<1x32xf32> to vector<8x32xf32>
    %80 = arith.mulf %78, %79 : vector<8x32xf32>
    %81 = vector.broadcast %60 : vector<1x32xf32> to vector<8x32xf32>
    %82 = arith.addf %80, %81 : vector<8x32xf32>
    %83 = arith.truncf %82 : vector<8x32xf32> to vector<8x32xbf16>
    %c0_20 = arith.constant 0 : index
    %c0_21 = arith.constant 0 : index
    %84 = vector.load %arg6[%c0_20, %c0_21] : memref<32x128xbf16, #tpu.memory_space<vmem>>, vector<32x128xbf16>
    %cst_22 = arith.constant dense<0.000000e+00> : vector<8x128xf32>
    %85 = tpu.matmul %83, %84, %cst_22 {dimension_numbers = #tpu.dot_dimension_numbers<[1], [0], [0], [1], [0, 0, 1, 1], [], []>} : vector<8x32xbf16>, vector<32x128xbf16>, vector<8x128xf32> -> vector<8x128xf32>
    %c0_23 = arith.constant 0 : index
    %c0_24 = arith.constant 0 : index
    %86 = vector.load %arg7[%c0_23, %c0_24] : memref<1x128xf32, #tpu.memory_space<vmem>>, vector<1x128xf32>
    %87 = vector.broadcast %86 : vector<1x128xf32> to vector<8x128xf32>
    %88 = arith.addf %85, %87 : vector<8x128xf32>
    %cst_25 = arith.constant 0.000000e+00 : f32
    %89 = vector.broadcast %cst_25 : f32 to vector<8x128xf32>
    %90 = arith.maximumf %88, %89 : vector<8x128xf32>
    %91 = arith.truncf %90 : vector<8x128xf32> to vector<8x128xbf16>
    %c0_26 = arith.constant 0 : index
    %c0_27 = arith.constant 0 : index
    %92 = vector.load %arg8[%c0_26, %c0_27] : memref<128x32xbf16, #tpu.memory_space<vmem>>, vector<128x32xbf16>
    %cst_28 = arith.constant dense<0.000000e+00> : vector<8x32xf32>
    %93 = tpu.matmul %91, %92, %cst_28 {dimension_numbers = #tpu.dot_dimension_numbers<[1], [0], [0], [1], [0, 0, 1, 1], [], []>} : vector<8x128xbf16>, vector<128x32xbf16>, vector<8x32xf32> -> vector<8x32xf32>
    %c0_29 = arith.constant 0 : index
    %c0_30 = arith.constant 0 : index
    %94 = vector.load %arg9[%c0_29, %c0_30] : memref<1x32xf32, #tpu.memory_space<vmem>>, vector<1x32xf32>
    %95 = vector.broadcast %94 : vector<1x32xf32> to vector<8x32xf32>
    %96 = arith.addf %93, %95 : vector<8x32xf32>
    %97 = arith.addf %96, %82 : vector<8x32xf32>
    %c0_31 = arith.constant 0 : index
    %c0_32 = arith.constant 0 : index
    %98 = vector.load %arg10[%c0_31, %c0_32] : memref<1x32xf32, #tpu.memory_space<vmem>>, vector<1x32xf32>
    %c0_33 = arith.constant 0 : index
    %c0_34 = arith.constant 0 : index
    %99 = vector.load %arg11[%c0_33, %c0_34] : memref<1x32xf32, #tpu.memory_space<vmem>>, vector<1x32xf32>
    %cst_35 = arith.constant dense<0.000000e+00> : vector<8xf32>
    %100 = vector.multi_reduction <add>, %97, %cst_35 [1] : vector<8x32xf32> to vector<8xf32>
    %101 = vector.shape_cast %100 : vector<8xf32> to vector<8x1xf32>
    %cst_36 = arith.constant 3.200000e+01 : f32
    %102 = vector.broadcast %cst_36 : f32 to vector<8x1xf32>
    %103 = arith.divf %101, %102 : vector<8x1xf32>
    %104 = vector.broadcast %103 : vector<8x1xf32> to vector<8x32xf32>
    %105 = arith.subf %97, %104 : vector<8x32xf32>
    %106 = arith.mulf %105, %105 : vector<8x32xf32>
    %cst_37 = arith.constant dense<0.000000e+00> : vector<8xf32>
    %107 = vector.multi_reduction <add>, %106, %cst_37 [1] : vector<8x32xf32> to vector<8xf32>
    %108 = vector.shape_cast %107 : vector<8xf32> to vector<8x1xf32>
    %cst_38 = arith.constant 3.200000e+01 : f32
    %109 = vector.broadcast %cst_38 : f32 to vector<8x1xf32>
    %110 = arith.divf %108, %109 : vector<8x1xf32>
    %111 = vector.broadcast %103 : vector<8x1xf32> to vector<8x32xf32>
    %112 = arith.subf %97, %111 : vector<8x32xf32>
    %cst_39 = arith.constant 9.99999974E-6 : f32
    %113 = vector.broadcast %cst_39 : f32 to vector<8x1xf32>
    %114 = arith.addf %110, %113 : vector<8x1xf32>
    %115 = math.rsqrt %114 : vector<8x1xf32>
    %116 = vector.broadcast %115 : vector<8x1xf32> to vector<8x32xf32>
    %117 = arith.mulf %112, %116 : vector<8x32xf32>
    %118 = vector.broadcast %98 : vector<1x32xf32> to vector<8x32xf32>
    %119 = arith.mulf %117, %118 : vector<8x32xf32>
    %120 = vector.broadcast %99 : vector<1x32xf32> to vector<8x32xf32>
    %121 = arith.addf %119, %120 : vector<8x32xf32>
    %c0_40 = arith.constant 0 : index
    %c0_41 = arith.constant 0 : index
    %c0_42 = arith.constant 0 : index
    %122 = vector.load %arg12[%c0_40, %c0_41, %c0_42] : memref<1x8x32xf32, #tpu.memory_space<vmem>>, vector<1x8x32xf32>
    %123 = vector.shape_cast %122 : vector<1x8x32xf32> to vector<8x32xf32>
    %124 = vector.shape_cast %121 : vector<8x32xf32> to vector<1x8x32xf32>
    tpu.vector_store %arg12[%c0_40, %c0_41, %c0_42], %124 {strides = array<i32>} : memref<1x8x32xf32, #tpu.memory_space<vmem>>, vector<1x8x32xf32>,
    return
  }
  func.func @transform_0(%arg0: i32) -> (i32, i32, i32) {
    %c0_i32 = arith.constant 0 : i32
    %c0_i32_0 = arith.constant 0 : i32
    %c0_i32_1 = arith.constant 0 : i32
    return %arg0, %c0_i32, %c0_i32_0 : i32, i32, i32
  }
  func.func @transform_1(%arg0: i32) -> (i32, i32) {
    %c0_i32 = arith.constant 0 : i32
    %c0_i32_0 = arith.constant 0 : i32
    %c0_i32_1 = arith.constant 0 : i32
    return %c0_i32, %c0_i32_0 : i32, i32
  }
  func.func @transform_2(%arg0: i32) -> (i32, i32) {
    %c0_i32 = arith.constant 0 : i32
    %c0_i32_0 = arith.constant 0 : i32
    %c0_i32_1 = arith.constant 0 : i32
    return %c0_i32, %c0_i32_0 : i32, i32
  }
  func.func @transform_3(%arg0: i32) -> (i32, i32) {
    %c0_i32 = arith.constant 0 : i32
    %c0_i32_0 = arith.constant 0 : i32
    %c0_i32_1 = arith.constant 0 : i32
    return %c0_i32, %c0_i32_0 : i32, i32
  }
  func.func @transform_4(%arg0: i32) -> (i32, i32) {
    %c0_i32 = arith.constant 0 : i32
    %c0_i32_0 = arith.constant 0 : i32
    %c0_i32_1 = arith.constant 0 : i32
    return %c0_i32, %c0_i32_0 : i32, i32
  }
  func.func @transform_5(%arg0: i32) -> (i32, i32) {
    %c0_i32 = arith.constant 0 : i32
    %c0_i32_0 = arith.constant 0 : i32
    %c0_i32_1 = arith.constant 0 : i32
    return %c0_i32, %c0_i32_0 : i32, i32
  }
  func.func @transform_6(%arg0: i32) -> (i32, i32) {
    %c0_i32 = arith.constant 0 : i32
    %c0_i32_0 = arith.constant 0 : i32
    %c0_i32_1 = arith.constant 0 : i32
    return %c0_i32, %c0_i32_0 : i32, i32
  }
  func.func @transform_7(%arg0: i32) -> (i32, i32) {
    %c0_i32 = arith.constant 0 : i32
    %c0_i32_0 = arith.constant 0 : i32
    %c0_i32_1 = arith.constant 0 : i32
    return %c0_i32, %c0_i32_0 : i32, i32
  }
  func.func @transform_8(%arg0: i32) -> (i32, i32) {
    %c0_i32 = arith.constant 0 : i32
    %c0_i32_0 = arith.constant 0 : i32
    %c0_i32_1 = arith.constant 0 : i32
    return %c0_i32, %c0_i32_0 : i32, i32
  }
  func.func @transform_9(%arg0: i32) -> (i32, i32) {
    %c0_i32 = arith.constant 0 : i32
    %c0_i32_0 = arith.constant 0 : i32
    %c0_i32_1 = arith.constant 0 : i32
    return %c0_i32, %c0_i32_0 : i32, i32
  }
  func.func @transform_10(%arg0: i32) -> (i32, i32) {
    %c0_i32 = arith.constant 0 : i32
    %c0_i32_0 = arith.constant 0 : i32
    %c0_i32_1 = arith.constant 0 : i32
    return %c0_i32, %c0_i32_0 : i32, i32
  }
  func.func @transform_11(%arg0: i32) -> (i32, i32, i32) {
    %c0_i32 = arith.constant 0 : i32
    %c0_i32_0 = arith.constant 0 : i32
    %c0_i32_1 = arith.constant 0 : i32
    return %arg0, %c0_i32, %c0_i32_0 : i32, i32, i32
  }
}

</mosaic_0001>

<bundles_post_ra>
// kernel: tpu_custom_call.1
= control target key start
LH: loop header
LB: loop body
LE: loop exit
PB: predicated region body
PF: predicated region fallthrough
CT: control target
= control target key end

     0   :  { %s2103_s0 = inlined_call_operand.vmem [shape: f32[2,8,32], index: 0, kind: input, shape index: {}]   ;;  %s2104_s1 = inlined_call_operand.vmem [shape: bf16[32,384], index: 1, kind: input, shape index: {}]   ;;  %s2105_s2 = inlined_call_operand.vmem [shape: bf16[128,32], index: 2, kind: input, shape index: {}]   ;;  %s2106_s3 = inlined_call_operand.vmem [shape: f32[1,32], index: 3, kind: input, shape index: {}]   ;;  %s2107_s4 = inlined_call_operand.vmem [shape: f32[1,32], index: 4, kind: input, shape index: {}]   ;;  %s2108_s5 = inlined_call_operand.vmem [shape: bf16[32,128], index: 5, kind: input, shape index: {}]   ;;  %s2109_s6 = inlined_call_operand.vmem [shape: f32[1,128], index: 6, kind: input, shape index: {}]   ;;  %s2110_s7 = inlined_call_operand.vmem [shape: bf16[128,32], index: 7, kind: input, shape index: {}]   ;;  %s2111_s8 = inlined_call_operand.vmem [shape: f32[1,32], index: 8, kind: input, shape index: {}]   ;;  %s2112_s9 = inlined_call_operand.vmem [shape: f32[1,32], index: 9, kind: input, shape index: {}]   ;;  %s2113_s10 = inlined_call_operand.vmem [shape: f32[1,32], index: 10, kind: input, shape index: {}]   ;;  %s2114_s11 = inlined_call_operand.hbm [shape: f32[2,8,32], index: 11, kind: output, shape index: {}]  }
   0x1   :  { %2116 = sst [smem:[#allocation5_spill]] %s2103_s0 }
   0x2   :  { %2117 = sst [smem:[#allocation6_spill]] %s2104_s1 }
   0x3   :  { %16 = vsyncpa [#allocation3], 0 }
   0x4   :  { %18 = vsyncpa [#allocation3 + $0x1], 0  ;;  %s1805_s17 = smov 0   ;;  %s1807_s18 = smov 0  }
   0x5   :  { %s1809_s19 = smov 0   ;;  %s1811_s20 = smov 0  }
   0x6 LB: > { %s1826_s21 = sadd.s32 4294967295, %s1736_s20   ;;  %s1388_s22 = sadd.s32 4294967294, %s1736_s20   ;;  %s1736_s20 = sphi %s1811_s20, %s2126_s20   ;;  %s1732_s19 = sphi %s1809_s19, %s2125_s19   ;;  %s1728_s18 = sphi %s1807_s18, %s2124_s18   ;;  %s1724_s17 = sphi %s1805_s17, %s2123_s17  }
   0x7   : > { %s1830_s23 = sadd.s32 1, %s1736_s20   ;;  %s267_s24 = sadd.s32 1, %s1732_s19 }
   0x8   : > { %s264_s25 = ssub.s32 %s1736_s20, %s1830_s23  ;;  %p277_p0 = scmp.ne.s32.totalorder %s1732_s19, %s1728_s18 }
   0x9   : > { %p265_p1 = scmp.eq.s32.totalorder %s264_s25, 0  ;;  %p278_p2 = scmp.eq.s32.totalorder %s1826_s21, 1 }
   0xa   : > { %p283_p3 = scmp.ne.s32.totalorder %s1728_s18, %s1724_s17  ;;  %p284_p4 = scmp.eq.s32.totalorder %s1388_s22, 1 }
   0xb   : > { %s1841_s26 = scalar_select %p265_p1, %s1732_s19, %s267_s24  }
   0xc   : > { %p1843_p5 = por %p278_p2, %p277_p0  ;;  %p1847_p6 = por %p284_p4, %p283_p3 }
   0xd   : > { %p1391_p7 = scmp.ge.s32.totalorder %s1736_s20, 1  ;;  %p339_p8 = scmp.lt.s32.totalorder %s1736_s20, 3 }
   0xf   : > { %p340_p9 = pnand %p1391_p7, %p339_p8 }
  0x10   : > { %s2120_s1 = sld [smem:[#allocation6_spill]] (!%p340_p9)  ;;  %p378_p10 = scmp.lt.s32.totalorder (!%p340_p9), %s1826_s21, 1  ;;  %v1738_v2 = vmov (!%p340_p9), 0   ;;  %vm425_vm0 = vcmask (!%p340_p9), 261120   ;;  %v1739_v7 = vmov (!%p340_p9), 0.0   ;;  %vm1740_vm1 = vmmov (!%p340_p9), 0  }
  0x11   : > { %343 = sbr.rel (%p340_p9) target bundleno = 2525 (0x9dd), region = 64  ;;  %461 = vmatprep.mubr.bf16.mxu0 (!%p340_p9), %v1738_v2  ;;  %s2121_s0 = sld [smem:[#allocation5_spill]] (!%p340_p9)  ;;  %1479 = vmatprep.subr.bf16.mxu1 (!%p340_p9), %v1739_v7  ;;  %vm770_vm2 = vcmask (!%p340_p9), 1043456   ;;  %vm718_vm3 = vcmask (!%p340_p9), 64512   ;;  %vm965_vm4 = vcmask (!%p340_p9), 523264   ;;  %vm967_vm5 = vcmask (!%p340_p9), 785408  }
  0x12   : > { %1483 = vmatprep.mubr.msk.bf16.mxu1 (!%p340_p9), %vm1740_vm1, %v1739_v7  ;;  %s2115_s22 = smov (!%p340_p9), 96   ;;  %s2122_s29 = smov (!%p340_p9), 96  }
  0x13   : > { %s375_s16 = sand.u32 (!%p340_p9), 1, %s1728_s18   ;;  %s1436_s13 = sshll.u32 (!%p340_p9), %s1826_s21, 7 }
  0x16   : > { %v1628_v0 = vld [vmem:[%s2120_s1 + $0x4] ss:$12 sps:$4 sm:$0xff] (!%p340_p9)   ;;  %v1630_v1 = vld [vmem:[%s2120_s1] ss:$12 sps:$4 sm:$0xff] (!%p340_p9)   ;;  %v1631_v3 = vld [vmem:[%s2120_s1 + $0x1c] ss:$12 sps:$4 sm:$0xff] (!%p340_p9)  }
  0x17   : > { %429 = vmatprep.subr.bf16.mxu0 (!%p340_p9), %v1628_v0  ;;  %v1633_v4 = vld [vmem:[%s2120_s1 + $0x18] ss:$12 sps:$4 sm:$0xff] (!%p340_p9)   ;;  %v1634_v8 = vld [vmem:[%s2120_s1 + $0x8] ss:$12 sps:$4 sm:$0xff] (!%p340_p9)   ;;  %v1635_v9 = vld [vmem:[%s2120_s1 + $0x20] ss:$12 sps:$4 sm:$0xff] (!%p340_p9)   ;;  %s2060_s1 = scalar_lea.hbm (!%p340_p9), %s2114_s11, %s1436_s13 }
  0x18   : > { %s379_s24 = scalar_select %p378_p10, %s1826_s21, 1  ;;  %430 = vmatpush1.bf16.msra.mxu0 %v1630_v1  ;;  %1480 = vmatpush3.bf16.msra.mxu1 %v1634_v8 }
  0x19   : > { %431 = vmatprep.subr.bf16.mxu0 %v1631_v3  ;;  %1481 = vmatprep.subr.bf16.mxu1 %v1739_v7  ;;  %s1744_s21 = smov [#allocation2]  }
  0x1a   : > { %s1393_s25 = sshll.u32 %s379_s24, 3  ;;  %s1742_s24 = smov 32  }
  0x1b   : > { %s381_s12 = scalar_lea.vmem %s2121_s0, %s1393_s25  ;;  %s1743_s25 = smov 64  }
  0x1c   : > { %v1870_v5 = vld [vmem:[%s381_s12] sm:$0xff]  ;;  %432 = vmatpush1.bf16.msra.mxu0 %v1633_v4  ;;  %1482 = vmatpush3.bf16.msra.mxu1 %v1635_v9 }
  0x1d   : > { %v384_v6 = vpack.c.bf16 %v1870_v5, %v1870_v5  ;;  %1487 = vmatprep.subr.bf16.mxu0 %v1739_v7  ;;  %1493 = vmatprep.subr.bf16.mxu1 %v1739_v7 }
  0x1f   : > { %1400 = vmatmul.mubr.msk.bf16.vlgmr.msra.gmra.mrb[0].mxu0 %vm425_vm0, %v384_v6  ;;  %1484 = vmatmul.mubr.msk.bf16.vlgmr.msra.gmra.mrb[0].mxu1 %vm425_vm0, %v384_v6 }
  0x20   : > { %1489 = vmatprep.mubr.msk.bf16.mxu0 %vm1740_vm1, %v1739_v7  ;;  %1495 = vmatprep.mubr.msk.bf16.mxu1 %vm1740_vm1, %v1739_v7 }
  0xf2   : > { %v463_v10 = vpop.f32.mrb[0].mxu0  ;;  %v504_v17 = vpop.f32.mrb[0].mxu1 }
  0xf3   : > { %v510_v11 = vpack.c.bf16 %v463_v10, %v463_v10  ;;  %v465_v12 = vpop.f32.mrb[1].mxu0  ;;  %v1485_v18 = vpop.f32.mrb[1].mxu1  ;;  %v1906_v27 = vpack.c.bf16 %v504_v17, %v504_v17 }
  0xf4   : > { %v511_v13 = vpack.c.bf16 %v465_v12, %v465_v12  ;;  %v467_v14 = vpop.f32.mrb[2].mxu0  ;;  %v507_v19 = vpop.f32.mrb[2].mxu1 }
  0xf5   : > { %514 = vrot.lane.b32.xlu1 %v510_v11, %s2115_s22  ;;  %v468_v15 = vpop.f32.mrb[3].mxu0  ;;  %v1486_v20 = vpop.f32.mrb[3].mxu1  ;;  %v772_v29 = vsel %vm770_vm2, %v1906_v27, 0 }
  0xf6   : > { %521 = vrot.lane.b32.xlu0 %v511_v13, %s2115_s22  ;;  %v538_v16 = vsel %vm425_vm0, %v511_v13, 0 }
  0xf7   : > { %1488 = vmatpush3.bf16.xpose.msra.mxu0 %v538_v16 }
  0xf8   : > { %1499 = vmatprep.subr.bf16.mxu0 %v1739_v7 }
  0xf9   : > { %525 = vrot.lane.b32.xlu1 %v511_v13, %s1742_s24 }
  0xfa   : > { %523 = vrot.lane.b32.xlu0 %v511_v13, %s1743_s25 }
  0xfd   : > { %518 = vrot.lane.b32.xlu1 %v510_v11, %s1742_s24 }
  0xfe   : > { %516 = vrot.lane.b32.xlu0 %v510_v11, %s1743_s25  ;;  %1490 = vmatmul.mubr.msk.bf16.vlgmr.msra.gmra.mrb[4].mxu0 %vm425_vm0, %v510_v11 }
  0xff   : > { %1501 = vmatprep.mubr.msk.bf16.mxu0 %vm1740_vm1, %v1739_v7 }
 0x167   : > { %v515_v21 = vpop.permute.xlu1 %514 }
 0x168   : > { %v522_v22 = vpop.permute.xlu0 %521 }
 0x169   : > { %v584_v23 = vsel %vm425_vm0, %v522_v22, 0 }
 0x16a   : > { %1494 = vmatpush3.bf16.xpose.msra.mxu1 %v584_v23 }
 0x16b   : > { %1505 = vmatprep.subr.bf16.mxu1 %v1739_v7  ;;  %v526_v26 = vpop.permute.xlu1 %525 }
 0x16c   : > { %v524_v24 = vpop.permute.xlu0 %523  ;;  %v676_v28 = vsel %vm425_vm0, %v526_v26, 0 }
 0x16d   : > { %v630_v25 = vsel %vm425_vm0, %v524_v24, 0 }
 0x16e   : > { %1500 = vmatpush3.bf16.xpose.msra.mxu0 %v630_v25 }
 0x16f   : > { %1511 = vmatprep.subr.bf16.mxu0 %v1739_v7  ;;  %v519_v31 = vpop.permute.xlu1 %518 }
 0x170   : > { %v517_v30 = vpop.permute.xlu0 %516 }
 0x171   : > { %1496 = vmatmul.mubr.msk.bf16.vlgmr.msra.gmra.mrb[4].mxu1 %vm425_vm0, %v515_v21 }
 0x172   : > { %1506 = vmatpush3.bf16.xpose.msra.mxu1 %v676_v28  ;;  %1507 = vmatprep.mubr.msk.bf16.mxu1 %vm1740_vm1, %v1739_v7 }
 0x173   : > { %1517 = vmatprep.subr.bf16.mxu1 %v1739_v7 }
 0x175   : > { %1502 = vmatmul.mubr.msk.bf16.vlgmr.msra.gmra.mrb[8].mxu0 %vm425_vm0, %v517_v30 }
 0x176   : > { %1512 = vmatpush3.bf16.msra.mxu0 %v772_v29  ;;  %1513 = vmatprep.mubr.msk.bf16.mxu0 %vm1740_vm1, %v1739_v7 }
 0x177   : > { %1523 = vmatprep.subr.bf16.mxu0 %v1739_v7 }
 0x179   : > { %1508 = vmatmul.mubr.msk.bf16.vlgmr.msra.gmra.mrb[8].mxu1 %vm425_vm0, %v519_v31 }
 0x17a   : > { %1519 = vmatprep.mubr.msk.bf16.mxu1 %vm1740_vm1, %v1739_v7 }
 0x1d1   : > { %v574_v32 = vpop.f32.mrb[4].mxu0 }
 0x1d2   : > { %v1491_v33 = vpop.f32.mrb[5].mxu0  ;;  %v719_v34 = vsel %vm718_vm3, %v574_v32, -inf }
 0x1d3   : > { %720 = vmax.xlane.f32.xlu0 %v719_v34  ;;  %v577_v35 = vpop.f32.mrb[6].mxu0  ;;  %v1637_v33 = vld [vmem:[%s2105_s2 + $0x8] sm:$0xff]   ;;  %v1638_v34 = vld [vmem:[%s2105_s2 + $0x10] sm:$0xff]  }
 0x1d4   : > { %v1492_v36 = vpop.f32.mrb[7].mxu0  ;;  %v1639_v35 = vld [vmem:[%s2105_s2 + $0x18] sm:$0xff]  }
 0x244   : > { %v620_v37 = vpop.f32.mrb[4].mxu1 }
 0x245   : > { %v1497_v38 = vpop.f32.mrb[5].mxu1  ;;  %v722_v39 = vsel %vm718_vm3, %v620_v37, -inf }
 0x246   : > { %723 = vmax.xlane.f32.xlu1 %v722_v39  ;;  %v623_v40 = vpop.f32.mrb[6].mxu1  ;;  %v1640_v39 = vld [vmem:[%s2105_s2 + $0x20] sm:$0xff]  }
 0x247   : > { %v1498_v41 = vpop.f32.mrb[7].mxu1 }
 0x248   : > { %v666_v42 = vpop.f32.mrb[8].mxu0  ;;  %v1641_v41 = vld [vmem:[%s2105_s2 + $0x28] sm:$0xff]  }
 0x249   : > { %v1503_v43 = vpop.f32.mrb[9].mxu0  ;;  %v725_v44 = vsel %vm718_vm3, %v666_v42, -inf }
 0x24a   : > { %726 = vmax.xlane.f32.xlu0 %v725_v44  ;;  %v669_v45 = vpop.f32.mrb[10].mxu0  ;;  %v1643_v43 = vld [vmem:[%s2105_s2 + $0x38] sm:$0xff]  }
 0x24b   : > { %v1504_v46 = vpop.f32.mrb[11].mxu0 }
 0x24c   : > { %v712_v47 = vpop.f32.mrb[8].mxu1 }
 0x24d   : > { %v1509_v48 = vpop.f32.mrb[9].mxu1  ;;  %v728_v49 = vsel %vm718_vm3, %v712_v47, -inf }
 0x24e   : > { %v715_v50 = vpop.f32.mrb[10].mxu1  ;;  %729 = vmax.xlane.f32.xlu0 %v728_v49 }
 0x24f   : > { %v1510_v51 = vpop.f32.mrb[11].mxu1 }
 0x257   : > { %528 = vrot.lane.b32.xlu1 %v1906_v27, %s2115_s22 }
 0x260   : > { %v721_v52 = vpop.xlane.xlu0 %720 }
 0x261   : > { %v731_v53 = vsub.f32 %v574_v32, %v721_v52  ;;  %v1636_v32 = vld [vmem:[%s2105_s2] sm:$0xff]  }
 0x263   : > { %v735_v54 = vmul.f32 1.442695, %v731_v53 }
 0x265   : > { %1654 = vpow2.f32 %v735_v54 }
 0x26f   : > { %v1655_v55 = vpop.eup %1654 }
 0x270   : > { %v743_v56 = vsel %vm718_vm3, %v1655_v55, 0.0 }
 0x27b   : > { %744 = vadd.xlane.f32.xlu1 %v743_v56 }
 0x2d3   : > { %v724_v57 = vpop.xlane.xlu1 %723 }
 0x2d4   : > { %v732_v58 = vsub.f32 %v620_v37, %v724_v57 }
 0x2d6   : > { %v737_v59 = vmul.f32 1.442695, %v732_v58 }
 0x2d7   : > { %v529_v60 = vpop.permute.xlu1 %528  ;;  %v727_v61 = vpop.xlane.xlu0 %726 }
 0x2d8   : > { %1656 = vpow2.f32 %v737_v59  ;;  %v818_v62 = vsel %vm770_vm2, %v529_v60, 0  ;;  %v733_v63 = vsub.f32 %v666_v42, %v727_v61  ;;  %v1642_v42 = vld [vmem:[%s2105_s2 + $0x30] sm:$0xff]  }
 0x2d9   : > { %1518 = vmatpush3.bf16.msra.mxu1 %v818_v62 }
 0x2da   : > { %v739_v0 = vmul.f32 1.442695, %v733_v63  ;;  %1529 = vmatprep.subr.bf16.mxu1 %v1739_v7 }
 0x2db   : > { %v730_v1 = vpop.xlane.xlu0 %729 }
 0x2dc   : > { %1658 = vpow2.f32 %v739_v0  ;;  %v734_v2 = vsub.f32 %v712_v47, %v730_v1 }
 0x2de   : > { %v741_v3 = vmul.f32 1.442695, %v734_v2 }
 0x2e0   : > { %1660 = vpow2.f32 %v741_v3 }
 0x2e2   : > { %v1657_v4 = vpop.eup %1656 }
 0x2e3   : > { %v746_v6 = vsel %vm718_vm3, %v1657_v4, 0.0 }
 0x2e4   : > { %747 = vadd.xlane.f32.xlu0 %v746_v6 }
 0x2e6   : > { %v1659_v8 = vpop.eup %1658 }
 0x2e7   : > { %v749_v9 = vsel %vm718_vm3, %v1659_v8, 0.0 }
 0x2e8   : > { %750 = vadd.xlane.f32.xlu1 %v749_v9 }
 0x2ea   : > { %v1661_v10 = vpop.eup %1660 }
 0x2eb   : > { %v752_v11 = vsel %vm718_vm3, %v1661_v10, 0.0 }
 0x2ec   : > { %753 = vadd.xlane.f32.xlu0 %v752_v11 }
 0x2f9   : > { %532 = vrot.lane.b32.xlu1 %v1906_v27, %s1742_s24 }
 0x302   : > { %530 = vrot.lane.b32.xlu0 %v1906_v27, %s1743_s25 }
 0x308   : > { %v745_v12 = vpop.xlane.xlu1 %744 }
 0x309   : > { %1662 = vrcp.f32 %v745_v12  ;;  %v1644_v12 = vld [vmem:[%s2108_s5] sm:$0xff]  }
 0x313   : > { %v1663_v13 = vpop.eup %1662 }
 0x314   : > { %v759_v14 = vmul.f32 %v1663_v13, %v1655_v55 }
 0x316   : > { %v763_v15 = vpack.c.bf16 %v759_v14, %v759_v14 }
 0x318   : > { %1514 = vmatmul.mubr.msk.bf16.vlgmr.msra.gmra.mrb[12].mxu0 %vm718_vm3, %v763_v15 }
 0x319   : > { %1525 = vmatprep.mubr.msk.bf16.mxu0 %vm1740_vm1, %v1739_v7 }
 0x371   : > { %v748_v16 = vpop.xlane.xlu0 %747 }
 0x372   : > { %1664 = vrcp.f32 %v748_v16 }
 0x375   : > { %v751_v17 = vpop.xlane.xlu1 %750 }
 0x376   : > { %1666 = vrcp.f32 %v751_v17  ;;  %v1418_v17 = vld [vmem:[%s2106_s3] ss:$0 sm:$0xff] }
 0x379   : > { %v754_v18 = vpop.xlane.xlu0 %753  ;;  %v533_v22 = vpop.permute.xlu1 %532 }
 0x37a   : > { %1668 = vrcp.f32 %v754_v18  ;;  %v910_v27 = vsel %vm770_vm2, %v533_v22, 0  ;;  %v1646_v22 = vld [vmem:[%s2110_s7] sm:$0xff]  }
 0x37c   : > { %v1665_v19 = vpop.eup %1664 }
 0x37d   : > { %v760_v20 = vmul.f32 %v1665_v19, %v1657_v4  ;;  %v531_v21 = vpop.permute.xlu0 %530  ;;  %v1419_v19 = vld [vmem:[%s2107_s4] ss:$0 sm:$0xff] }
 0x37e   : > { %v864_v23 = vsel %vm770_vm2, %v531_v21, 0 }
 0x37f   : > { %1524 = vmatpush3.bf16.msra.mxu0 %v864_v23  ;;  %v764_v24 = vpack.c.bf16 %v760_v20, %v760_v20 }
 0x380   : > { %v1667_v25 = vpop.eup %1666  ;;  %1535 = vmatprep.subr.bf16.mxu0 %v1739_v7 }
 0x381   : > { %v761_v26 = vmul.f32 %v1667_v25, %v1659_v8  ;;  %1520 = vmatmul.mubr.msk.bf16.vlgmr.msra.gmra.mrb[12].mxu1 %vm718_vm3, %v764_v24  ;;  %v1647_v24 = vld [vmem:[%s2110_s7 + $0x8] sm:$0xff]   ;;  %v1648_v25 = vld [vmem:[%s2110_s7 + $0x10] sm:$0xff]  }
 0x382   : > { %1530 = vmatpush3.bf16.msra.mxu1 %v910_v27  ;;  %1531 = vmatprep.mubr.msk.bf16.mxu1 %vm1740_vm1, %v1739_v7  ;;  %v1650_v27 = vld [vmem:[%s2110_s7 + $0x20] sm:$0xff]  }
 0x383   : > { %v765_v28 = vpack.c.bf16 %v761_v26, %v761_v26  ;;  %1555 = vmatprep.subr.bf16.mxu1 %v1739_v7  ;;  %v1649_v26 = vld [vmem:[%s2110_s7 + $0x18] sm:$0xff]  }
 0x384   : > { %v1669_v29 = vpop.eup %1668 }
 0x385   : > { %v762_v30 = vmul.f32 %v1669_v29, %v1661_v10  ;;  %1526 = vmatmul.mubr.msk.bf16.vlgmr.msra.gmra.mrb[16].mxu0 %vm718_vm3, %v765_v28  ;;  %v1651_v28 = vld [vmem:[%s2110_s7 + $0x28] sm:$0xff]   ;;  %v1652_v29 = vld [vmem:[%s2110_s7 + $0x30] sm:$0xff]  }
 0x386   : > { %1551 = vmatprep.mubr.msk.bf16.mxu0 %vm1740_vm1, %v1739_v7  ;;  %1536 = vmatpush3.bf16.msra.mxu0 %v1636_v32 }
 0x387   : > { %v766_v31 = vpack.c.bf16 %v762_v30, %v762_v30  ;;  %1537 = vmatprep.subr.bf16.mxu0 %v1739_v7  ;;  %v1653_v30 = vld [vmem:[%s2110_s7 + $0x38] sm:$0xff]  }
 0x389   : > { %1532 = vmatmul.mubr.msk.bf16.vlgmr.msra.gmra.mrb[16].mxu1 %vm718_vm3, %v766_v31  ;;  %v1420_v31 = vld [vmem:[%s2109_s6] ss:$0 sm:$0xff] }
 0x38a   : > { %1559 = vmatprep.mubr.msk.bf16.mxu1 %vm1740_vm1, %v1739_v7  ;;  %1538 = vmatpush3.bf16.msra.mxu0 %v1637_v33 }
 0x38b   : > { %1539 = vmatprep.subr.bf16.mxu0 %v1739_v7  ;;  %1556 = vmatpush3.bf16.msra.mxu1 %v1644_v12 }
 0x38c   : > { %1557 = vmatprep.subr.bf16.mxu1 %v1739_v7 }
 0x38e   : > { %1540 = vmatpush3.bf16.msra.mxu0 %v1638_v34 }
 0x38f   : > { %1541 = vmatprep.subr.bf16.mxu0 %v1739_v7 }
 0x392   : > { %1542 = vmatpush3.bf16.msra.mxu0 %v1639_v35 }
 0x393   : > { %1543 = vmatprep.subr.bf16.mxu0 %v1739_v7 }
 0x396   : > { %1544 = vmatpush3.bf16.msra.mxu0 %v1640_v39 }
 0x397   : > { %1545 = vmatprep.subr.bf16.mxu0 %v1739_v7 }
 0x39a   : > { %1546 = vmatpush3.bf16.msra.mxu0 %v1641_v41 }
 0x39b   : > { %1547 = vmatprep.subr.bf16.mxu0 %v1739_v7 }
 0x39e   : > { %1548 = vmatpush3.bf16.msra.mxu0 %v1642_v42 }
 0x39f   : > { %1549 = vmatprep.subr.bf16.mxu0 %v1739_v7 }
 0x3a2   : > { %1550 = vmatpush3.bf16.msra.mxu0 %v1643_v43 }
 0x3eb   : > { %v808_v36 = vpop.f32.mrb[12].mxu0 }
 0x3ec   : > { %v1515_v37 = vpop.f32.mrb[13].mxu0 }
 0x3ed   : > { %v811_v38 = vpop.f32.mrb[14].mxu0 }
 0x3ee   : > { %v1516_v40 = vpop.f32.mrb[15].mxu0 }
 0x454   : > { %v854_v44 = vpop.f32.mrb[12].mxu1 }
 0x455   : > { %953 = vrot.lane.b32.xlu1 %v854_v44, %s1742_s24  ;;  %v1521_v45 = vpop.f32.mrb[13].mxu1  ;;  %s1316_s24 = scalar_lea.sflag [#allocation3], %s375_s16 }
 0x456   : > { %v857_v46 = vpop.f32.mrb[14].mxu1 }
 0x457   : > { %v1522_v47 = vpop.f32.mrb[15].mxu1 }
 0x458   : > { %v900_v48 = vpop.f32.mrb[16].mxu0 }
 0x459   : > { %957 = vrot.lane.b32.xlu0 %v900_v48, %s1743_s25  ;;  %v1527_v49 = vpop.f32.mrb[17].mxu0 }
 0x45a   : > { %v903_v50 = vpop.f32.mrb[18].mxu0 }
 0x45b   : > { %v1528_v51 = vpop.f32.mrb[19].mxu0 }
 0x45c   : > { %v946_v52 = vpop.f32.mrb[16].mxu1 }
 0x45d   : > { %961 = vrot.lane.b32.xlu1 %v946_v52, %s2122_s29  ;;  %v1533_v53 = vpop.f32.mrb[17].mxu1  ;;  %s1392_s29 = sshll.u32 %s375_s16, 3 }
 0x45e   : > { %v949_v54 = vpop.f32.mrb[18].mxu1  ;;  %s377_s22 = scalar_lea.vmem [#allocation2], %s1392_s29  ;;  %s1678_s29 = sshll.u32 %s1744_s21, 4  ;;  %s1679_s29 = int_to_ptr.vmem [resolvable:$false] %s1678_s29 }
 0x45f   : > { %v1534_v55 = vpop.f32.mrb[19].mxu1  ;;  %s1329_s14 = sshll.u32 %s377_s22, 4  ;;  %s1680_s30 = scalar_lea.vmem %s1679_s29, 256  ;;  %s2062_s14 = int_to_ptr.vmem [resolvable:$true] %s1329_s14 }
 0x460   : > { %v1433_v55 = vld [vmem:[%s2112_s9] ss:$0 sm:$0xff]  ;;  %s1674_s25 = scalar_lea.vmem %s2062_s14, 128  ;;  %p1681_p0 = scmp.lt.s32.totalorder %s2062_s14, %s1679_s29 }
 0x461   : > { %p1675_p11 = scmp.ne.s32.totalorder %s2062_s14, %s1674_s25  ;;  %p1682_p1 = scmp.lt.s32.totalorder %s1680_s30, %s1674_s25 }
 0x463   : > { %p1676_p12 = pnand %p1675_p11, %p1843_p5  ;;  %p1683_p2 = por %p1682_p1, %p1681_p0 }
 0x465   : > { %p1677_p13 = pneg %p1676_p12 }
 0x467   : > { %p1684_p3 = pnand %p1683_p2, %p1677_p13 }
 0x4c7   : > { %v954_v56 = vpop.permute.xlu1 %953 }
 0x4c8   : > { %v964_v58 = vsel %vm425_vm0, %v808_v36, %v954_v56 }
 0x4cb   : > { %v958_v57 = vpop.permute.xlu0 %957 }
 0x4cc   : > { %v966_v59 = vsel %vm965_vm4, %v964_v58, %v958_v57  ;;  %v1434_v57 = vld [vmem:[%s2113_s10] ss:$0 sm:$0xff] }
 0x4cf   : > { %v962_v60 = vpop.permute.xlu1 %961 }
 0x4d0   : > { %v968_v61 = vsel %vm967_vm5, %v966_v59, %v962_v60 }
 0x4d1   : > { %v969_v62 = vpack.c.bf16 %v968_v61, %v968_v61 }
 0x4d3   : > { %1552 = vmatmul.mubr.bf16.vlgmr.msra.gmra.mrb[20].mxu0 %v969_v62 }
 0x5a6   : > { %v1068_v63 = vpop.f32.mrb[20].mxu0 }
 0x5a7   : > { %v1069_v0 = vadd.f32 %v1068_v63, %v1870_v5  ;;  %v1553_v1 = vpop.f32.mrb[21].mxu0  ;;  %v1645_v5 = vld [vmem:[%s2108_s5 + $0x8] sm:$0xff]  }
 0x5a8   : > { %v1071_v2 = vpop.f32.mrb[22].mxu0  ;;  %1558 = vmatpush3.bf16.msra.mxu1 %v1645_v5 }
 0x5a9   : > { %v1554_v3 = vpop.f32.mrb[23].mxu0  ;;  %v1076_v4 = vsel %vm425_vm0, %v1069_v0, 0.0  ;;  %1563 = vmatprep.subr.bf16.mxu1 %v1739_v7 }
 0x5aa   : > { %1077 = vadd.xlane.f32.xlu0 %v1076_v4 }
 0x637   : > { %v1078_v6 = vpop.xlane.xlu0 %1077 }
 0x638   : > { %v1080_v8 = vmul.f32 0.03125, %v1078_v6 }
 0x63a   : > { %v1081_v9 = vsub.f32 %v1069_v0, %v1080_v8 }
 0x63c   : > { %v1082_v10 = vmul.f32 %v1081_v9, %v1081_v9 }
 0x63e   : > { %v1083_v11 = vsel %vm425_vm0, %v1082_v10, 0.0 }
 0x63f   : > { %1084 = vadd.xlane.f32.xlu1 %v1083_v11 }
 0x6cc   : > { %v1085_v13 = vpop.xlane.xlu1 %1084 }
 0x6cd   : > { %v1086_v14 = vmul.f32 0.03125, %v1085_v13 }
 0x6cf   : > { %v1087_v15 = vadd.f32 1e-05, %v1086_v14 }
 0x6d1   : > { %1670 = vrsqrt.f32 %v1087_v15 }
 0x6db   : > { %v1671_v16 = vpop.eup %1670 }
 0x6dc   : > { %v1089_v18 = vmul.f32 %v1671_v16, %v1081_v9 }
 0x6de   : > { %v1096_v20 = vmul.f32 %v1418_v17, %v1089_v18 }
 0x6e0   : > { %v1103_v21 = vadd.f32 %v1419_v19, %v1096_v20 }
 0x6e2   : > { %v1104_v23 = vpack.c.bf16 %v1103_v21, %v1103_v21 }
 0x6e4   : > { %1560 = vmatmul.mubr.msk.bf16.vlgmr.msra.gmra.mrb[20].mxu1 %vm425_vm0, %v1104_v23 }
 0x6e5   : > { %1564 = vmatpush3.bf16.msra.mxu1 %v1646_v22  ;;  %1579 = vmatprep.mubr.msk.bf16.mxu1 %vm1740_vm1, %v1739_v7 }
 0x6e6   : > { %1565 = vmatprep.subr.bf16.mxu1 %v1739_v7 }
 0x6e9   : > { %1566 = vmatpush3.bf16.msra.mxu1 %v1647_v24 }
 0x6ea   : > { %1567 = vmatprep.subr.bf16.mxu1 %v1739_v7 }
 0x6ed   : > { %1568 = vmatpush3.bf16.msra.mxu1 %v1648_v25 }
 0x6ee   : > { %1569 = vmatprep.subr.bf16.mxu1 %v1739_v7 }
 0x6f1   : > { %1570 = vmatpush3.bf16.msra.mxu1 %v1649_v26 }
 0x6f2   : > { %1571 = vmatprep.subr.bf16.mxu1 %v1739_v7 }
 0x6f5   : > { %1572 = vmatpush3.bf16.msra.mxu1 %v1650_v27 }
 0x6f6   : > { %1573 = vmatprep.subr.bf16.mxu1 %v1739_v7 }
 0x6f9   : > { %1574 = vmatpush3.bf16.msra.mxu1 %v1651_v28 }
 0x6fa   : > { %1575 = vmatprep.subr.bf16.mxu1 %v1739_v7 }
 0x6fd   : > { %1576 = vmatpush3.bf16.msra.mxu1 %v1652_v29 }
 0x6fe   : > { %1577 = vmatprep.subr.bf16.mxu1 %v1739_v7  ;;  %v1424_v7 = vld [vmem:[%s2111_s8] ss:$0 sm:$0xff] }
 0x701   : > { %1578 = vmatpush3.bf16.msra.mxu1 %v1653_v30 }
 0x7b7   : > { %v1165_v32 = vpop.f32.mrb[20].mxu1 }
 0x7b8   : > { %v1166_v33 = vadd.f32 %v1420_v31, %v1165_v32  ;;  %v1561_v34 = vpop.f32.mrb[21].mxu1 }
 0x7b9   : > { %v1168_v35 = vpop.f32.mrb[22].mxu1 }
 0x7ba   : > { %v1171_v36 = vmax.f32 %v1166_v33, 0.0  ;;  %v1562_v37 = vpop.f32.mrb[23].mxu1 }
 0x7bc   : > { %v1172_v38 = vpack.c.bf16 %v1171_v36, %v1171_v36 }
 0x7be   : > { %1580 = vmatmul.mubr.bf16.vlgmr.msra.gmra.mrb[24].mxu1 %v1172_v38 }
 0x891   : > { %v1278_v39 = vpop.f32.mrb[24].mxu1 }
 0x892   : > { %v1279_v40 = vadd.f32 %v1424_v7, %v1278_v39  ;;  %v1581_v41 = vpop.f32.mrb[25].mxu1 }
 0x893   : > { %v1281_v42 = vpop.f32.mrb[26].mxu1 }
 0x894   : > { %v1582_v43 = vpop.f32.mrb[27].mxu1  ;;  %v1284_v44 = vadd.f32 %v1279_v40, %v1103_v21 }
 0x896   : > { %v1287_v45 = vsel %vm425_vm0, %v1284_v44, 0.0 }
 0x897   : > { %1288 = vadd.xlane.f32.xlu0 %v1287_v45 }
 0x924   : > { %v1289_v46 = vpop.xlane.xlu0 %1288 }
 0x925   : > { %v1290_v47 = vmul.f32 0.03125, %v1289_v46 }
 0x927   : > { %v1291_v48 = vsub.f32 %v1284_v44, %v1290_v47 }
 0x929   : > { %v1292_v49 = vmul.f32 %v1291_v48, %v1291_v48 }
 0x92b   : > { %v1293_v50 = vsel %vm425_vm0, %v1292_v49, 0.0 }
 0x92c   : > { %1294 = vadd.xlane.f32.xlu0 %v1293_v50 }
 0x9b9   : > { %v1295_v51 = vpop.xlane.xlu0 %1294 }
 0x9ba   : > { %v1296_v52 = vmul.f32 0.03125, %v1295_v51 }
 0x9bc   : > { %v1297_v53 = vadd.f32 1e-05, %v1296_v52 }
 0x9be   : > { %1672 = vrsqrt.f32 %v1297_v53 }
 0x9c8   : > { %v1673_v54 = vpop.eup %1672 }
 0x9c9   : > { %v1299_v56 = vmul.f32 %v1673_v54, %v1291_v48 }
 0x9cb   : > { %v1306_v58 = vmul.f32 %v1433_v55, %v1299_v56 }
 0x9cd   : > { %v1313_v59 = vadd.f32 %v1434_v57, %v1306_v58 }
 0x9cf   : > { %1314 = vst.msk [vmem:[%s377_s22] sm:$0xff] %vm425_vm0, %v1313_v59 }
 0x9d0   : > { %1687 = shalt.err (!%p1684_p3)
}
 0x9d1   : > { %s1688_s0 = scalar_lea.hbm %s2060_s1, 128  ;;  %s1692_s13 = scalar_lea.hbm %s2114_s11, 256 }
 0x9d2   : > { %p1689_p4 = scmp.ne.s32.totalorder %s2060_s1, %s1688_s0  ;;  %p1693_p9 = scmp.lt.u32.totalorder %s2060_s1, %s2114_s11 }
 0x9d3   : > { %p1694_p10 = scmp.lt.u32.totalorder %s1692_s13, %s1688_s0  ;;  %p1696_p12 = scmp.lt.u32.totalorder %s1688_s0, %s2060_s1 }
 0x9d4   : > { %p1690_p7 = pnand %p1689_p4, %p1843_p5 }
 0x9d5   : > { %p1695_p11 = por %p1694_p10, %p1693_p9 }
 0x9d6   : > { %p1691_p8 = pneg %p1690_p7 }
 0x9d7   : > { %p1697_p13 = por %p1696_p12, %p1695_p11 }
 0x9d9   : > { %p1698_p0 = pnand %p1697_p13, %p1691_p8 }
 0x9db   : > { %1701 = shalt.err (!%p1698_p0)
}
 0x9dc   : > { %1583 = dma.vmem_to_hbm [thread:$0]  (%p1843_p5), %s2062_s14, 128, %s2060_s1, %s1316_s24  }
 0x9dd PF: > { %p1589_p1 = scmp.ge.s32.totalorder %s1736_s20, 2  ;;  %s1341_s25 = sand.u32 1, %s1724_s17  }
 0x9de   : > { %s1342_s21 = scalar_lea.sflag [#allocation3], %s1341_s25 }
 0x9df   : > { %p1586_p2 = pnand %p1589_p1, %p1847_p6 }
 0x9e1   : > { %1719 = dma.done.wait (!%p1586_p2), %s1342_s21, 128  }
 0x9e2   : > { %1721 = vsyncadd (!%p1586_p2), %s1342_s21, 4294967168  ;;  %p21_p3 = scmp.ge.s32.totalorder %s1830_s23, 4   ;;  %s2123_s17 = smov %s1728_s18 }
 0x9e3   : > { %s2124_s18 = smov %s1732_s19  ;;  %s2125_s19 = smov %s1841_s26 }
 0x9e4   : > { %s2126_s20 = smov %s1830_s23  ;;  %23 = sbr.rel (!%p21_p3) target bundleno = 6 (0x6), region = 99 }
 0x9eb   :  { %1347 = vsyncpa [#allocation3], 1 }
 0x9ec   :  { %1349 = vsyncpa [#allocation3 + $0x1], 1 }

</bundles_post_ra>
